<compile_context>
chip_gen: v5e
topology: v5e:2x2
jax: 0.10.0
libtpu: 0.0.40
codegen_flags: <defaults>
</compile_context>

<pallas_src>
import jax
import jax.numpy as jnp
from jax.experimental import pallas as pl
from jax.experimental.pallas import tpu as pltpu


def classify_kernel(x_ref, w1_ref, shift_ref, pool_ref, w2_ref, b2_ref, o_ref):
    # x_ref:     (B*L, C1)  bf16   input, channels-last, batch*length flattened
    # w1_ref:    (C1, C_)   bf16   pointwise conv weight with BN scale folded in
    # shift_ref: (1, C_)    f32    folded BN shift = beta - mean * scale
    # pool_ref:  (B, B*L)   bf16   averaging matrix (1/L on own-batch columns)
    # w2_ref:    (C_, C2)   bf16   linear weight (transposed)
    # b2_ref:    (1, C2)    f32    linear bias
    # o_ref:     (B, C2)    f32    softmax probabilities

    # k=1 Conv1d (+ folded BN scale) == one 2D bf16 MXU matmul, f32 accumulate.
    h = jnp.dot(x_ref[...], w1_ref[...],
                preferred_element_type=jnp.float32)          # (B*L, C_)

    # Folded BN shift + SiLU. exp and the reciprocal both go to the EUP slot,
    # keeping the VALU path to a single add + single mul per vreg.
    h = h + shift_ref[...]
    h = h * pl.reciprocal(1.0 + jnp.exp(-h), approx=True)    # SiLU

    # AdaptiveAvgPool1d(1) + flatten(1): mean over L, expressed as a tiny
    # (B, B*L) @ (B*L, C_) MXU matmul so everything stays 2D (no XLU reduce).
    pooled = jnp.dot(pool_ref[...], h.astype(pool_ref.dtype),
                     preferred_element_type=jnp.float32)     # (B, C_)

    # Dropout is identity in eval mode (inference semantics).
    # Linear layer (bf16 MXU, f32 accumulate).
    logits = jnp.dot(pooled.astype(w2_ref.dtype), w2_ref[...],
                     preferred_element_type=jnp.float32) + b2_ref[...]  # (B, C2)

    # Softmax over classes (module is in eval mode -> returns softmax).
    m = jnp.max(logits, axis=-1, keepdims=True)
    e = jnp.exp(logits - m)
    probs = e * pl.reciprocal(jnp.sum(e, axis=-1, keepdims=True), approx=True)

    o_ref[...] = probs.astype(o_ref.dtype)


def classify_forward(x_ncl, conv_w, bn_gamma, bn_beta, bn_mean, bn_var,
                     lin_w, lin_b, eps=1e-5):
    """x_ncl: (B, C1, L) float32, PyTorch NCL layout. Returns (B, C2) softmax."""
    B, C1, L = x_ncl.shape
    BL = B * L

    # layout: NCL -> (B*L, C1) so channels are the lane (last) dimension and
    # the pointwise conv becomes one clean 2D matmul.
    x2d = jnp.transpose(x_ncl, (0, 2, 1)).reshape(BL, C1).astype(jnp.bfloat16)

    # Fold BN scale into the conv weight; only the shift remains in-kernel.
    scale = bn_gamma / jnp.sqrt(bn_var + eps)                       # (C_,)
    w1f = (conv_w[:, :, 0] * scale[:, None]).T.astype(jnp.bfloat16)  # (C1, C_)
    shift = (bn_beta - bn_mean * scale).reshape(1, -1).astype(jnp.float32)

    # Averaging matrix for the mean-pool matmul: pool[b, b*L + l] = 1/L.
    pool = (jnp.repeat(jnp.eye(B, dtype=jnp.float32), L, axis=1) / L
            ).astype(jnp.bfloat16)                                   # (B, B*L)

    w2 = lin_w.T.astype(jnp.bfloat16)                                # (C_, C2)
    b2 = lin_b.reshape(1, -1).astype(jnp.float32)                    # (1, C2)

    C_ = w1f.shape[1]
    C2 = w2.shape[1]

    # Advisory cost estimate: this launch is overhead-dominated, help XLA
    # schedule it relative to the surrounding (tiny) prep ops.
    flops = 2 * BL * C1 * C_ + 2 * B * BL * C_ + 2 * B * C_ * C2
    transcendentals = BL * C_ + B * C2
    bytes_accessed = (x2d.size * 2 + w1f.size * 2 + shift.size * 4 +
                      pool.size * 2 + w2.size * 2 + b2.size * 4 + B * C2 * 4)

    # Problem is tiny (~65 KB of operands): every array fits in VMEM as a
    # single full block, single grid step.
    return pl.pallas_call(
        classify_kernel,
        out_shape=jax.ShapeDtypeStruct((B, C2), jnp.float32),
        grid=(1,),
        in_specs=[
            pl.BlockSpec((BL, C1), lambda i: (0, 0)),
            pl.BlockSpec((C1, C_), lambda i: (0, 0)),
            pl.BlockSpec((1, C_), lambda i: (0, 0)),
            pl.BlockSpec((B, BL), lambda i: (0, 0)),
            pl.BlockSpec((C_, C2), lambda i: (0, 0)),
            pl.BlockSpec((1, C2), lambda i: (0, 0)),
        ],
        out_specs=pl.BlockSpec((B, C2), lambda i: (0, 0)),
        compiler_params=pltpu.CompilerParams(
            dimension_semantics=("arbitrary",),
            vmem_limit_bytes=32 * 1024 * 1024,
        ),
        cost_estimate=pl.CostEstimate(
            flops=flops,
            transcendentals=transcendentals,
            bytes_accessed=bytes_accessed,
        ),
    )(x2d, w1f, shift, pool, w2, b2)


def classify_reference(x_ncl, conv_w, bn_gamma, bn_beta, bn_mean, bn_var,
                       lin_w, lin_b, eps=1e-5):
    """Pure-JAX f32 reference for verification (same eval-mode semantics)."""
    x = jnp.transpose(x_ncl, (0, 2, 1)).astype(jnp.float32)     # (B, L, C1)
    h = jnp.einsum("blc,dc->bld", x, conv_w[:, :, 0])           # (B, L, C_)
    scale = bn_gamma / jnp.sqrt(bn_var + eps)
    h = h * scale + (bn_beta - bn_mean * scale)
    h = h * jax.nn.sigmoid(h)
    pooled = jnp.mean(h, axis=1)                                # (B, C_)
    logits = pooled @ lin_w.T + lin_b
    return jax.nn.softmax(logits, axis=1)


if __name__ == "__main__":
    # Small, deterministic problem consistent with the module:
    #   c1 = 4 input channels, c2 = 8 classes, length L = 16, batch B = 2.
    #   Hidden width c_ = 1280 is fixed by the module definition.
    B, C1, L, C2 = 2, 4, 16, 8
    C_HID = 1280

    key = jax.random.PRNGKey(0)
    kx, kw1, kg, kb, km, kv, kw2, kb2 = jax.random.split(key, 8)

    x_ncl = jax.random.normal(kx, (B, C1, L), dtype=jnp.float32)

    conv_w = jax.random.normal(kw1, (C_HID, C1, 1), dtype=jnp.float32) * 0.1
    bn_gamma = 1.0 + 0.1 * jax.random.normal(kg, (C_HID,), dtype=jnp.float32)
    bn_beta = 0.1 * jax.random.normal(kb, (C_HID,), dtype=jnp.float32)
    bn_mean = 0.1 * jax.random.normal(km, (C_HID,), dtype=jnp.float32)
    bn_var = jnp.abs(jax.random.normal(kv, (C_HID,), dtype=jnp.float32)) + 0.5
    lin_w = jax.random.normal(kw2, (C2, C_HID), dtype=jnp.float32) * 0.05
    lin_b = 0.1 * jax.random.normal(kb2, (C2,), dtype=jnp.float32)

    out = classify_forward(x_ncl, conv_w, bn_gamma, bn_beta, bn_mean, bn_var,
                           lin_w, lin_b)
    out = jax.block_until_ready(out)

    ref = classify_reference(x_ncl, conv_w, bn_gamma, bn_beta, bn_mean, bn_var,
                             lin_w, lin_b)
    assert out.shape == (B, C2)
    # Tolerances account for bf16 MXU inputs (f32 accumulate) and the
    # approximate EUP reciprocal used for SiLU / softmax normalization.
    assert jnp.allclose(out, ref, atol=5e-3, rtol=5e-2), "mismatch vs reference"
    assert jnp.allclose(jnp.sum(out, axis=1), 1.0, atol=2e-3), "softmax rows != 1"

    print("KERNEL_OK")
</pallas_src>

<mosaic_0001>
module attributes {stable_mosaic.version = 11 : i64} {
  func.func @classify_kernel(%arg0: i32, %arg1: memref<32x4xbf16, #tpu.memory_space<vmem>>, %arg2: memref<4x1280xbf16, #tpu.memory_space<vmem>>, %arg3: memref<1x1280xf32, #tpu.memory_space<vmem>>, %arg4: memref<2x32xbf16, #tpu.memory_space<vmem>>, %arg5: memref<1280x8xbf16, #tpu.memory_space<vmem>>, %arg6: memref<1x8xf32, #tpu.memory_space<vmem>>, %arg7: memref<2x8xf32, #tpu.memory_space<vmem>>) attributes {dimension_semantics = [#tpu.dimension_semantics<arbitrary>], iteration_bounds = array<i64: 1>, scalar_prefetch = 0 : i64, scratch_operands = 0 : i64, tpu.core_type = #tpu.core_type<tc>, window_params = [{pipeline_mode = #tpu.pipeline_mode<synchronous>, transform_indices = @transform_0, window_bounds = array<i64: 32, 4>}, {pipeline_mode = #tpu.pipeline_mode<synchronous>, transform_indices = @transform_1, window_bounds = array<i64: 4, 1280>}, {pipeline_mode = #tpu.pipeline_mode<synchronous>, transform_indices = @transform_2, window_bounds = array<i64: 1, 1280>}, {pipeline_mode = #tpu.pipeline_mode<synchronous>, transform_indices = @transform_3, window_bounds = array<i64: 2, 32>}, {pipeline_mode = #tpu.pipeline_mode<synchronous>, transform_indices = @transform_4, window_bounds = array<i64: 1280, 8>}, {pipeline_mode = #tpu.pipeline_mode<synchronous>, transform_indices = @transform_5, window_bounds = array<i64: 1, 8>}, {pipeline_mode = #tpu.pipeline_mode<synchronous>, transform_indices = @transform_6, window_bounds = array<i64: 2, 8>}]} {
    %c0 = arith.constant 0 : index
    %c0_0 = arith.constant 0 : index
    %0 = vector.load %arg1[%c0, %c0_0] : memref<32x4xbf16, #tpu.memory_space<vmem>>, vector<32x4xbf16>
    %c0_1 = arith.constant 0 : index
    %c0_2 = arith.constant 0 : index
    %1 = vector.load %arg2[%c0_1, %c0_2] : memref<4x1280xbf16, #tpu.memory_space<vmem>>, vector<4x1280xbf16>
    %cst = arith.constant dense<0.000000e+00> : vector<32x1280xf32>
    %2 = tpu.matmul %0, %1, %cst {dimension_numbers = #tpu.dot_dimension_numbers<[1], [0], [0], [1], [0, 0, 1, 1], [], []>} : vector<32x4xbf16>, vector<4x1280xbf16>, vector<32x1280xf32> -> vector<32x1280xf32>
    %c0_3 = arith.constant 0 : index
    %c0_4 = arith.constant 0 : index
    %3 = vector.load %arg3[%c0_3, %c0_4] : memref<1x1280xf32, #tpu.memory_space<vmem>>, vector<1x1280xf32>
    %4 = vector.broadcast %3 : vector<1x1280xf32> to vector<32x1280xf32>
    %5 = arith.addf %2, %4 : vector<32x1280xf32>
    %cst_5 = arith.constant 0.000000e+00 : f32
    %6 = vector.broadcast %cst_5 : f32 to vector<32x1280xf32>
    %7 = arith.subf %6, %5 : vector<32x1280xf32>
    %8 = math.exp %7 : vector<32x1280xf32>
    %cst_6 = arith.constant 1.000000e+00 : f32
    %9 = vector.broadcast %cst_6 : f32 to vector<32x1280xf32>
    %10 = arith.addf %9, %8 : vector<32x1280xf32>
    %11 = tpu.reciprocal %10 {approx = true} : vector<32x1280xf32> -> vector<32x1280xf32>
    %12 = arith.mulf %5, %11 : vector<32x1280xf32>
    %c0_7 = arith.constant 0 : index
    %c0_8 = arith.constant 0 : index
    %13 = vector.load %arg4[%c0_7, %c0_8] : memref<2x32xbf16, #tpu.memory_space<vmem>>, vector<2x32xbf16>
    %14 = arith.truncf %12 : vector<32x1280xf32> to vector<32x1280xbf16>
    %cst_9 = arith.constant dense<0.000000e+00> : vector<2x1280xf32>
    %15 = tpu.matmul %13, %14, %cst_9 {dimension_numbers = #tpu.dot_dimension_numbers<[1], [0], [0], [1], [0, 0, 1, 1], [], []>} : vector<2x32xbf16>, vector<32x1280xbf16>, vector<2x1280xf32> -> vector<2x1280xf32>
    %16 = arith.truncf %15 : vector<2x1280xf32> to vector<2x1280xbf16>
    %c0_10 = arith.constant 0 : index
    %c0_11 = arith.constant 0 : index
    %17 = vector.load %arg5[%c0_10, %c0_11] : memref<1280x8xbf16, #tpu.memory_space<vmem>>, vector<1280x8xbf16>
    %cst_12 = arith.constant dense<0.000000e+00> : vector<2x8xf32>
    %18 = tpu.matmul %16, %17, %cst_12 {dimension_numbers = #tpu.dot_dimension_numbers<[1], [0], [0], [1], [0, 0, 1, 1], [], []>} : vector<2x1280xbf16>, vector<1280x8xbf16>, vector<2x8xf32> -> vector<2x8xf32>
    %c0_13 = arith.constant 0 : index
    %c0_14 = arith.constant 0 : index
    %19 = vector.load %arg6[%c0_13, %c0_14] : memref<1x8xf32, #tpu.memory_space<vmem>>, vector<1x8xf32>
    %20 = vector.broadcast %19 : vector<1x8xf32> to vector<2x8xf32>
    %21 = arith.addf %18, %20 : vector<2x8xf32>
    %cst_15 = arith.constant dense<0xFF800000> : vector<2xf32>
    %22 = vector.multi_reduction <maximumf>, %21, %cst_15 [1] : vector<2x8xf32> to vector<2xf32>
    %23 = vector.shape_cast %22 : vector<2xf32> to vector<2x1xf32>
    %24 = vector.broadcast %23 : vector<2x1xf32> to vector<2x8xf32>
    %25 = arith.subf %21, %24 : vector<2x8xf32>
    %26 = math.exp %25 : vector<2x8xf32>
    %cst_16 = arith.constant dense<0.000000e+00> : vector<2xf32>
    %27 = vector.multi_reduction <add>, %26, %cst_16 [1] : vector<2x8xf32> to vector<2xf32>
    %28 = vector.shape_cast %27 : vector<2xf32> to vector<2x1xf32>
    %29 = tpu.reciprocal %28 {approx = true} : vector<2x1xf32> -> vector<2x1xf32>
    %30 = vector.broadcast %29 : vector<2x1xf32> to vector<2x8xf32>
    %31 = arith.mulf %26, %30 : vector<2x8xf32>
    %c0_17 = arith.constant 0 : index
    %c0_18 = arith.constant 0 : index
    %32 = vector.load %arg7[%c0_17, %c0_18] : memref<2x8xf32, #tpu.memory_space<vmem>>, vector<2x8xf32>
    tpu.vector_store %arg7[%c0_17, %c0_18], %31 {strides = array<i32>} : memref<2x8xf32, #tpu.memory_space<vmem>>, vector<2x8xf32>,
    return
  }
  func.func @transform_0(%arg0: i32) -> (i32, i32) {
    %c0_i32 = arith.constant 0 : i32
    %c0_i32_0 = arith.constant 0 : i32
    %c0_i32_1 = arith.constant 0 : i32
    return %c0_i32, %c0_i32_0 : i32, i32
  }
  func.func @transform_1(%arg0: i32) -> (i32, i32) {
    %c0_i32 = arith.constant 0 : i32
    %c0_i32_0 = arith.constant 0 : i32
    %c0_i32_1 = arith.constant 0 : i32
    return %c0_i32, %c0_i32_0 : i32, i32
  }
  func.func @transform_2(%arg0: i32) -> (i32, i32) {
    %c0_i32 = arith.constant 0 : i32
    %c0_i32_0 = arith.constant 0 : i32
    %c0_i32_1 = arith.constant 0 : i32
    return %c0_i32, %c0_i32_0 : i32, i32
  }
  func.func @transform_3(%arg0: i32) -> (i32, i32) {
    %c0_i32 = arith.constant 0 : i32
    %c0_i32_0 = arith.constant 0 : i32
    %c0_i32_1 = arith.constant 0 : i32
    return %c0_i32, %c0_i32_0 : i32, i32
  }
  func.func @transform_4(%arg0: i32) -> (i32, i32) {
    %c0_i32 = arith.constant 0 : i32
    %c0_i32_0 = arith.constant 0 : i32
    %c0_i32_1 = arith.constant 0 : i32
    return %c0_i32, %c0_i32_0 : i32, i32
  }
  func.func @transform_5(%arg0: i32) -> (i32, i32) {
    %c0_i32 = arith.constant 0 : i32
    %c0_i32_0 = arith.constant 0 : i32
    %c0_i32_1 = arith.constant 0 : i32
    return %c0_i32, %c0_i32_0 : i32, i32
  }
  func.func @transform_6(%arg0: i32) -> (i32, i32) {
    %c0_i32 = arith.constant 0 : i32
    %c0_i32_0 = arith.constant 0 : i32
    %c0_i32_1 = arith.constant 0 : i32
    return %c0_i32, %c0_i32_0 : i32, i32
  }
}

</mosaic_0001>

<bundles_post_ra>
// kernel: tpu_custom_call.1
= control target key start
LH: loop header
LB: loop body
LE: loop exit
PB: predicated region body
PF: predicated region fallthrough
CT: control target
= control target key end

     0   :  { %s2777_s0 = inlined_call_operand.vmem [shape: bf16[32,4], index: 0, kind: input, shape index: {}]   ;;  %s2778_s1 = inlined_call_operand.vmem [shape: bf16[4,1280], index: 1, kind: input, shape index: {}]   ;;  %s2779_s2 = inlined_call_operand.vmem [shape: f32[1,1280], index: 2, kind: input, shape index: {}]   ;;  %s2780_s3 = inlined_call_operand.vmem [shape: bf16[2,32], index: 3, kind: input, shape index: {}]   ;;  %s2781_s4 = inlined_call_operand.vmem [shape: bf16[1280,8], index: 4, kind: input, shape index: {}]   ;;  %s2782_s5 = inlined_call_operand.vmem [shape: f32[1,8], index: 5, kind: input, shape index: {}]   ;;  %s2783_s6 = inlined_call_operand.hbm [shape: f32[2,8], index: 6, kind: output, shape index: {}]  }
   0x1   :  { %v29_v0 = vld [vmem:[%s2778_s1] sm:$0xff]  ;;  %v30_v1 = vld [vmem:[%s2778_s1 + $0x8] sm:$0xff] }
   0x2   :  { %67 = vst [vmem:[#allocation1] ss:$4 sm:$0xff] %v29_v0 }
   0x3   :  { %70 = vst [vmem:[#allocation1 + $0x20] ss:$4 sm:$0xff] %v30_v1 }
   0x4   :  { %11 = vsyncpa [#allocation3], 0  ;;  %vm90_vm0 = vcmask 1041408   ;;  %v31_v2 = vld [vmem:[%s2778_s1 + $0x10] sm:$0xf]  ;;  %v1867_v8 = vld [vmem:[%s2777_s0] sm:$0xff] }
   0x5   :  { %vm83_vm1 = vcmask 31744   ;;  %v1868_v24 = vld [vmem:[%s2777_s0 + $0x8] sm:$0xff]  ;;  %v2225_v25 = vld [vmem:[%s2779_s2] sm:$0xff]  ;;  %vm562_vm2 = vcmask 261120   ;;  %vm1480_vm3 = vcmask 58368   ;;  %s1500_s7 = sshll.u32 %s2783_s6, 4  ;;  %s1501_s7 = int_to_ptr.hbm [resolvable:$true] %s1500_s7 }
   0x6   :  { %v2228_v26 = vperm.slane %v2225_v25, 0  ;;  %v2231_v27 = vperm.slane %v2225_v25, 1  ;;  %v2242_v34 = vperm.slane %v2225_v25, 2  ;;  %v2245_v35 = vperm.slane %v2225_v25, 3 }
   0x9   :  { %v71_v3 = vld.sshfl [vmem:[#allocation1] sm:$0xff pattern:$0x73625140]  ;;  %v72_v4 = vld.sshfl [vmem:[#allocation1 + $0x8] sm:$0xff pattern:$0x73625140] }
   0xa   :  { %v91_v5 = vsel %vm90_vm0, %v71_v3, 0  ;;  %v93_v6 = vsel %vm90_vm0, %v72_v4, 0  ;;  %v73_v7 = vld.sshfl [vmem:[#allocation1 + $0x10] sm:$0xff pattern:$0x73625140] }
   0xb   :  { %118 = vmatpush.bf16.msra.mxu0 %v91_v5  ;;  %137 = vmatpush.bf16.msra.mxu1 %v93_v6  ;;  %v95_v9 = vsel %vm90_vm0, %v73_v7, 0  ;;  %v74_v10 = vld.sshfl [vmem:[#allocation1 + $0x18] sm:$0xff pattern:$0x73625140] }
   0xc   :  { %156 = vmatpush.bf16.msra.mxu2 %v95_v9  ;;  %80 = vst [vmem:[#allocation1] ss:$4 sm:$0xff] %v31_v2  ;;  %v97_v11 = vsel %vm90_vm0, %v74_v10, 0  ;;  %v75_v12 = vld.sshfl [vmem:[#allocation1 + $0x20] sm:$0xff pattern:$0x73625140] }
   0xd   :  { %175 = vmatpush.bf16.msra.mxu3 %v97_v11  ;;  %v99_v13 = vsel %vm90_vm0, %v75_v12, 0  ;;  %v76_v14 = vld.sshfl [vmem:[#allocation1 + $0x28] sm:$0xff pattern:$0x73625140] }
   0xe   :  { %1517 = vmatmul.msk.bf16.vlgmr.msra.gmra.mxu0 %vm83_vm1, %v1867_v8  ;;  %1519 = vmatmul.msk.bf16.vlgmr.msra.gmra.mxu1 %vm83_vm1, %v1867_v8  ;;  %v101_v15 = vsel %vm90_vm0, %v76_v14, 0  ;;  %v77_v16 = vld.sshfl [vmem:[#allocation1 + $0x30] sm:$0xff pattern:$0x73625140] }
   0xf   :  { %1521 = vmatmul.msk.bf16.vlgmr.msra.gmra.mxu2 %vm83_vm1, %v1867_v8  ;;  %194 = vmatpush.bf16.msrb.mxu0 %v99_v13  ;;  %v103_v17 = vsel %vm90_vm0, %v77_v16, 0  ;;  %v78_v18 = vld.sshfl [vmem:[#allocation1 + $0x38] sm:$0xff pattern:$0x73625140] }
  0x10   :  { %1523 = vmatmul.msk.bf16.vlgmr.msra.gmra.mxu3 %vm83_vm1, %v1867_v8  ;;  %213 = vmatpush.bf16.msrb.mxu1 %v101_v15  ;;  %v105_v19 = vsel %vm90_vm0, %v78_v18, 0 }
  0x11   :  { %232 = vmatpush.bf16.msrb.mxu2 %v103_v17  ;;  %251 = vmatpush.bf16.msrb.mxu3 %v105_v19 }
  0x13   :  { %v81_v20 = vld.sshfl [vmem:[#allocation1] sm:$0xff pattern:$0x73625140]  ;;  %v82_v21 = vld.sshfl [vmem:[#allocation1 + $0x8] sm:$0xff pattern:$0x73625140] }
  0x14   :  { %v107_v22 = vsel %vm90_vm0, %v81_v20, 0  ;;  %v109_v23 = vsel %vm90_vm0, %v82_v21, 0 }
  0x15   :  { %270 = vmatpush.bf16.msra.mxu0 %v107_v22  ;;  %289 = vmatpush.bf16.msra.mxu1 %v109_v23 }
  0x1e   :  { %1518 = vmatmul.msk.bf16.gmra.mxu0 %vm83_vm1, %v1868_v24  ;;  %1520 = vmatmul.msk.bf16.gmra.mxu1 %vm83_vm1, %v1868_v24 }
  0x1f   :  { %1522 = vmatmul.msk.bf16.gmra.mxu2 %vm83_vm1, %v1868_v24 }
  0x20   :  { %1524 = vmatmul.msk.bf16.gmra.mxu3 %vm83_vm1, %v1868_v24 }
  0x2e   :  { %1525 = vmatmul.msk.bf16.vlgmr.msrb.gmra.mxu0 %vm83_vm1, %v1867_v8  ;;  %1527 = vmatmul.msk.bf16.vlgmr.msrb.gmra.mxu1 %vm83_vm1, %v1867_v8 }
  0x2f   :  { %1529 = vmatmul.msk.bf16.vlgmr.msrb.gmra.mxu2 %vm83_vm1, %v1867_v8 }
  0x30   :  { %1531 = vmatmul.msk.bf16.vlgmr.msrb.gmra.mxu3 %vm83_vm1, %v1867_v8 }
  0x3e   :  { %1526 = vmatmul.msk.bf16.gmra.mxu0 %vm83_vm1, %v1868_v24  ;;  %1528 = vmatmul.msk.bf16.gmra.mxu1 %vm83_vm1, %v1868_v24 }
  0x3f   :  { %1530 = vmatmul.msk.bf16.gmra.mxu2 %vm83_vm1, %v1868_v24 }
  0x40   :  { %1532 = vmatmul.msk.bf16.gmra.mxu3 %vm83_vm1, %v1868_v24 }
  0x4e   :  { %1533 = vmatmul.msk.bf16.vlgmr.msra.gmra.mxu0 %vm83_vm1, %v1867_v8  ;;  %1535 = vmatmul.msk.bf16.vlgmr.msra.gmra.mxu1 %vm83_vm1, %v1867_v8 }
  0x5e   :  { %1534 = vmatmul.msk.bf16.gmra.mxu0 %vm83_vm1, %v1868_v24  ;;  %1536 = vmatmul.msk.bf16.gmra.mxu1 %vm83_vm1, %v1868_v24 }
  0x8b   :  { %v120_v28 = vpop.f32.mrf.mxu0  ;;  %v139_v29 = vpop.f32.mrf.mxu1 }
  0x8c   :  { %v2234_v30 = vadd.f32 %v120_v28, %v2228_v26  ;;  %v2237_v31 = vadd.f32 %v139_v29, %v2231_v27 }
  0x8e   :  { %v301_v32 = vsub.f32 0.0, %v2234_v30  ;;  %v302_v33 = vsub.f32 0.0, %v2237_v31 }
  0x90   :  { %v341_v36 = vmul.f32 1.442695, %v301_v32  ;;  %v343_v38 = vmul.f32 1.442695, %v302_v33 }
  0x92   :  { %v158_v37 = vpop.f32.mrf.mxu2  ;;  %1951 = vpow2.f32 %v341_v36 }
  0x93   :  { %v2248_v39 = vadd.f32 %v158_v37, %v2242_v34  ;;  %v177_v40 = vpop.f32.mrf.mxu3  ;;  %v122_v41 = vpop.f32.mrf.mxu0  ;;  %1953 = vpow2.f32 %v343_v38 }
  0x94   :  { %v2251_v42 = vadd.f32 %v177_v40, %v2245_v35  ;;  %v2254_v43 = vadd.f32 %v122_v41, %v2228_v26  ;;  %v141_v44 = vpop.f32.mrf.mxu1  ;;  %v2298_v40 = vperm.slane %v2225_v25, 4 }
  0x95   :  { %v303_v45 = vsub.f32 0.0, %v2248_v39  ;;  %v2258_v46 = vadd.f32 %v141_v44, %v2231_v27 }
  0x96   :  { %v304_v47 = vsub.f32 0.0, %v2251_v42  ;;  %v311_v50 = vsub.f32 0.0, %v2254_v43 }
  0x97   :  { %v345_v48 = vmul.f32 1.442695, %v303_v45  ;;  %v312_v51 = vsub.f32 0.0, %v2258_v46 }
  0x98   :  { %v347_v49 = vmul.f32 1.442695, %v304_v47  ;;  %v1952_v53 = vpop.eup %1951  ;;  %v361_v57 = vmul.f32 1.442695, %v311_v50 }
  0x99   :  { %1955 = vpow2.f32 %v345_v48  ;;  %v1954_v60 = vpop.eup %1953  ;;  %v363_v61 = vmul.f32 1.442695, %v312_v51  ;;  %v421_v0 = vadd.f32 1.0, %v1952_v53 }
  0x9a   :  { %1957 = vpow2.f32 %v347_v49  ;;  %v160_v52 = vpop.f32.mrf.mxu2  ;;  %v422_v6 = vadd.f32 1.0, %v1954_v60 }
  0x9b   :  { %v2264_v54 = vadd.f32 %v160_v52, %v2242_v34  ;;  %v179_v55 = vpop.f32.mrf.mxu3  ;;  %v125_v56 = vpop.f32.mrf.mxu0  ;;  %1959 = vpow2.f32 %v361_v57 }
  0x9c   :  { %v2267_v58 = vadd.f32 %v125_v56, %v2228_v26  ;;  %v144_v59 = vpop.f32.mrf.mxu1  ;;  %v2274_v1 = vadd.f32 %v179_v55, %v2245_v35  ;;  %1961 = vpow2.f32 %v363_v61  ;;  %v2309_v56 = vperm.slane %v2225_v25, 5 }
  0x9d   :  { %v313_v62 = vsub.f32 0.0, %v2264_v54  ;;  %v2271_v63 = vadd.f32 %v144_v59, %v2231_v27  ;;  %1963 = vrcp.f32 %v421_v0 }
  0x9e   :  { %v321_v2 = vsub.f32 0.0, %v2267_v58  ;;  %v314_v10 = vsub.f32 0.0, %v2274_v1 }
  0x9f   :  { %v1956_v3 = vpop.eup %1955  ;;  %v365_v4 = vmul.f32 1.442695, %v313_v62  ;;  %v322_v7 = vsub.f32 0.0, %v2271_v63 }
  0xa0   :  { %v1958_v5 = vpop.eup %1957  ;;  %v381_v8 = vmul.f32 1.442695, %v321_v2  ;;  %v423_v9 = vadd.f32 1.0, %v1956_v3  ;;  %v367_v23 = vmul.f32 1.442695, %v314_v10 }
  0xa1   :  { %v424_v12 = vadd.f32 1.0, %v1958_v5  ;;  %1965 = vpow2.f32 %v365_v4  ;;  %v383_v16 = vmul.f32 1.442695, %v322_v7  ;;  %v1960_v22 = vpop.eup %1959  ;;  %v2319_v4 = vperm.slane %v2225_v25, 6 }
  0xa2   :  { %v163_v11 = vpop.f32.mrf.mxu2  ;;  %1967 = vrcp.f32 %v422_v6  ;;  %v1962_v29 = vpop.eup %1961 }
  0xa3   :  { %v2280_v13 = vadd.f32 %v163_v11, %v2242_v34  ;;  %v182_v14 = vpop.f32.mrf.mxu3  ;;  %v127_v15 = vpop.f32.mrf.mxu0  ;;  %1969 = vpow2.f32 %v381_v8  ;;  %v432_v44 = vadd.f32 1.0, %v1962_v29 }
  0xa4   :  { %v2283_v17 = vadd.f32 %v182_v14, %v2245_v35  ;;  %v2286_v18 = vadd.f32 %v127_v15, %v2228_v26  ;;  %v146_v19 = vpop.f32.mrf.mxu1  ;;  %1971 = vrcp.f32 %v423_v9  ;;  %v2295_v33 = vpop.eup %1963  ;;  %v2326_v14 = vperm.slane %v2225_v25, 7 }
  0xa5   :  { %v323_v20 = vsub.f32 0.0, %v2280_v13  ;;  %v2290_v21 = vadd.f32 %v146_v19, %v2231_v27  ;;  %1973 = vrcp.f32 %v424_v12  ;;  %v431_v27 = vadd.f32 1.0, %v1960_v22 }
  0xa6   :  { %v324_v24 = vsub.f32 0.0, %v2283_v17  ;;  %v331_v28 = vsub.f32 0.0, %v2286_v18  ;;  %1975 = vpow2.f32 %v383_v16 }
  0xa7   :  { %v385_v32 = vmul.f32 1.442695, %v323_v20  ;;  %v332_v26 = vsub.f32 0.0, %v2290_v21  ;;  %v1966_v38 = vpop.eup %1965 }
  0xa8   :  { %v387_v36 = vmul.f32 1.442695, %v324_v24  ;;  %v401_v37 = vmul.f32 1.442695, %v331_v28  ;;  %v2300_v41 = vpop.eup %1967  ;;  %v433_v53 = vadd.f32 1.0, %v1966_v38 }
  0xa9   :  { %1977 = vpow2.f32 %v385_v32  ;;  %v1970_v47 = vpop.eup %1969  ;;  %v403_v48 = vmul.f32 1.442695, %v332_v26 }
  0xaa   :  { %1979 = vpow2.f32 %v367_v23  ;;  %v165_v45 = vpop.f32.mrf.mxu2  ;;  %v1972_v52 = vpop.eup %1971  ;;  %v441_v60 = vadd.f32 1.0, %v1970_v47 }
  0xab   :  { %1981 = vpow2.f32 %v387_v36  ;;  %v2303_v49 = vadd.f32 %v165_v45, %v2242_v34  ;;  %v184_v50 = vpop.f32.mrf.mxu3  ;;  %v196_v51 = vpop.f32.mrf.mxu0 }
  0xac   :  { %1983 = vpow2.f32 %v401_v37  ;;  %v2306_v55 = vadd.f32 %v184_v50, %v2245_v35  ;;  %v215_v57 = vpop.f32.mrf.mxu1  ;;  %v2311_v59 = vpop.eup %1973  ;;  %v2315_v34 = vadd.f32 %v196_v51, %v2298_v40  ;;  %v2345_v50 = vmul.f32 %v2300_v41, %v2237_v31 }
  0xad   :  { %1985 = vrcp.f32 %v431_v27  ;;  %v333_v61 = vsub.f32 0.0, %v2303_v49  ;;  %v1976_v62 = vpop.eup %1975  ;;  %v2323_v9 = vadd.f32 %v215_v57, %v2309_v56  ;;  %v2351_v57 = vmul.f32 %v1972_v52, %v2248_v39 }
  0xae   :  { %1987 = vrcp.f32 %v432_v44  ;;  %v334_v0 = vsub.f32 0.0, %v2306_v55  ;;  %v442_v35 = vadd.f32 1.0, %v1976_v62  ;;  %v305_v8 = vsub.f32 0.0, %v2315_v34 }
  0xaf   :  { %v1978_v2 = vpop.eup %1977  ;;  %1989 = vpow2.f32 %v403_v48  ;;  %v405_v3 = vmul.f32 1.442695, %v333_v61  ;;  %v306_v36 = vsub.f32 0.0, %v2323_v9  ;;  %v2341_v48 = vmul.f32 %v2295_v33, %v2234_v30 }
  0xb0   :  { %v1980_v5 = vpop.eup %1979  ;;  %1991 = vrcp.f32 %v433_v53  ;;  %v443_v6 = vadd.f32 1.0, %v1978_v2  ;;  %v407_v11 = vmul.f32 1.442695, %v334_v0  ;;  %v349_v26 = vmul.f32 1.442695, %v305_v8 }
  0xb1   :  { %v1982_v7 = vpop.eup %1981  ;;  %1993 = vrcp.f32 %v441_v60  ;;  %v434_v32 = vadd.f32 1.0, %v1980_v5  ;;  %v351_v61 = vmul.f32 1.442695, %v306_v36 }
  0xb2   :  { %v1984_v10 = vpop.eup %1983  ;;  %1995 = vrcp.f32 %v442_v35  ;;  %v234_v12 = vpop.f32.mrf.mxu2  ;;  %v444_v16 = vadd.f32 1.0, %v1982_v7 }
  0xb3   :  { %v1986_v15 = vpop.eup %1985  ;;  %v451_v19 = vadd.f32 1.0, %v1984_v10  ;;  %1997 = vpow2.f32 %v405_v3  ;;  %v2329_v20 = vadd.f32 %v234_v12, %v2319_v4  ;;  %v253_v22 = vpop.f32.mrf.mxu3 }
  0xb4   :  { %v198_v23 = vpop.f32.mrf.mxu0  ;;  %v1988_v24 = vpop.eup %1987  ;;  %1999 = vrcp.f32 %v443_v6  ;;  %v2334_v27 = vadd.f32 %v253_v22, %v2326_v14  ;;  %v2354_v60 = vmul.f32 %v1986_v15, %v2254_v43 }
  0xb5   :  { %v217_v28 = vpop.f32.mrf.mxu1  ;;  %v1990_v29 = vpop.eup %1989  ;;  %2001 = vrcp.f32 %v451_v19  ;;  %v307_v38 = vsub.f32 0.0, %v2329_v20  ;;  %v2337_v45 = vadd.f32 %v198_v23, %v2298_v40  ;;  %v2358_v2 = vmul.f32 %v1988_v24, %v2258_v46 }
  0xb6   :  { %v1992_v25 = vpop.eup %1991  ;;  %v452_v37 = vadd.f32 1.0, %v1990_v29  ;;  %2003 = vpow2.f32 %v407_v11  ;;  %v2348_v51 = vadd.f32 %v217_v28, %v2309_v56  ;;  %v308_v31 = vsub.f32 0.0, %v2334_v27 }
  0xb7   :  { %v1994_v44 = vpop.eup %1993  ;;  %2005 = vrcp.f32 %v444_v16  ;;  %v353_v33 = vmul.f32 1.442695, %v307_v38  ;;  %v315_v39 = vsub.f32 0.0, %v2337_v45  ;;  %v542_v12 = vpack.c.bf16 %v2354_v60, %v2341_v48 }
  0xb8   :  { %v1996_v47 = vpop.eup %1995  ;;  %2007 = vrcp.f32 %v452_v37  ;;  %v521_v35 = vmul.f32 %v1994_v44, %v2267_v58  ;;  %v316_v7 = vsub.f32 0.0, %v2348_v51  ;;  %v355_v19 = vmul.f32 1.442695, %v308_v31 }
  0xb9   :  { %v1998_v53 = vpop.eup %1997  ;;  %2009 = vpow2.f32 %v349_v26  ;;  %v522_v16 = vmul.f32 %v1996_v47, %v2271_v63  ;;  %v369_v24 = vmul.f32 1.442695, %v315_v39  ;;  %v543_v63 = vpack.c.bf16 %v2358_v2, %v2345_v50 }
  0xba   :  { %v2000_v62 = vpop.eup %1999  ;;  %2011 = vrcp.f32 %v434_v32  ;;  %v453_v30 = vadd.f32 1.0, %v1998_v53  ;;  %v236_v41 = vpop.f32.mrf.mxu2  ;;  %v2379_v32 = vmul.f32 %v1992_v25, %v2264_v54  ;;  %v371_v26 = vmul.f32 1.442695, %v316_v7 }
  0xbb   :  { %v2002_v0 = vpop.eup %2001  ;;  %v2363_v43 = vadd.f32 %v236_v41, %v2319_v4  ;;  %v255_v52 = vpop.f32.mrf.mxu3  ;;  %v523_v37 = vmul.f32 %v2000_v62, %v2280_v13 }
  0xbc   :  { %v201_v3 = vpop.f32.mrf.mxu0  ;;  %v2004_v5 = vpop.eup %2003  ;;  %v531_v6 = vmul.f32 %v2002_v0, %v2286_v18  ;;  %2013 = vrcp.f32 %v453_v30 }
  0xbd   :  { %v2368_v8 = vadd.f32 %v201_v3, %v2298_v40  ;;  %v220_v46 = vpop.f32.mrf.mxu1  ;;  %v2006_v10 = vpop.eup %2005  ;;  %v454_v11 = vadd.f32 1.0, %v2004_v5  ;;  %2015 = vpow2.f32 %v351_v61  ;;  %v317_v28 = vsub.f32 0.0, %v2363_v43 }
  0xbe   :  { %v2371_v58 = vadd.f32 %v220_v46, %v2309_v56  ;;  %v2008_v15 = vpop.eup %2007  ;;  %v552_v18 = vpack.c.bf16 %v531_v6, %v521_v35  ;;  %2017 = vpow2.f32 %v353_v33  ;;  %v524_v48 = vmul.f32 %v2006_v10, %v2283_v17 }
  0xbf   :  { %v2010_v22 = vpop.eup %2009  ;;  %v532_v23 = vmul.f32 %v2008_v15, %v2290_v21  ;;  %2019 = vrcp.f32 %v454_v11  ;;  %v325_v36 = vsub.f32 0.0, %v2368_v8  ;;  %v2386_v21 = vadd.f32 %v255_v52, %v2326_v14  ;;  %v2405_v52 = vld [vmem:[%s2780_s3] sm:$0x1] }
  0xc0   :  { %v2012_v29 = vpop.eup %2011  ;;  %572 = vmatpush.bf16.msra.mxu2 %v552_v18  ;;  %v326_v44 = vsub.f32 0.0, %v2371_v58  ;;  %v425_v54 = vadd.f32 1.0, %v2010_v22  ;;  %2021 = vpow2.f32 %v355_v19  ;;  %v373_v50 = vmul.f32 1.442695, %v317_v28 }
  0xc1   :  { %v553_v38 = vpack.c.bf16 %v532_v23, %v522_v16  ;;  %2023 = vpow2.f32 %v369_v24  ;;  %v389_v33 = vmul.f32 1.442695, %v325_v36  ;;  %v318_v2 = vsub.f32 0.0, %v2386_v21 }
  0xc2   :  { %v2014_v47 = vpop.eup %2013  ;;  %v239_v25 = vpop.f32.mrf.mxu2  ;;  %2025 = vpow2.f32 %v371_v26  ;;  %v391_v35 = vmul.f32 1.442695, %v326_v44  ;;  %v514_v6 = vmul.f32 %v2012_v29, %v2274_v1  ;;  %v504_v19 = vmul.f32 %v2311_v59, %v2251_v42 }
  0xc3   :  { %v2016_v53 = vpop.eup %2015  ;;  %v533_v60 = vmul.f32 %v2014_v47, %v2303_v49  ;;  %585 = vmatpush.bf16.msra.mxu3 %v553_v38  ;;  %v2392_v13 = vadd.f32 %v239_v25, %v2319_v4  ;;  %v258_v61 = vpop.f32.mrf.mxu3  ;;  %2027 = vrcp.f32 %v425_v54  ;;  %v375_v22 = vmul.f32 1.442695, %v318_v2 }
  0xc4   :  { %v203_v62 = vpop.f32.mrf.mxu0  ;;  %v2018_v30 = vpop.eup %2017  ;;  %v2395_v17 = vadd.f32 %v258_v61, %v2326_v14  ;;  %573 = vmatpush.bf16.msra.mxu2 %v542_v12  ;;  %v426_v5 = vadd.f32 1.0, %v2016_v53  ;;  %2029 = vpow2.f32 %v373_v50  ;;  %v545_v59 = vpack.c.bf16 %v514_v6, %v504_v19  ;;  %v33_v50 = vld [vmem:[%s2779_s2 + $0x8] sm:$0x3] }
  0xc5   :  { %v2398_v31 = vadd.f32 %v203_v62, %v2298_v40  ;;  %v222_v41 = vpop.f32.mrf.mxu1  ;;  %v2020_v49 = vpop.eup %2019  ;;  %v554_v0 = vpack.c.bf16 %v533_v60, %v523_v37  ;;  %v327_v39 = vsub.f32 0.0, %v2392_v13  ;;  %v427_v7 = vadd.f32 1.0, %v2018_v30 }
  0xc6   :  { %v534_v3 = vmul.f32 %v2020_v49, %v2306_v55  ;;  %v2411_v46 = vadd.f32 %v222_v41, %v2309_v56  ;;  %v2413_v10 = vpop.eup %2021  ;;  %2031 = vpow2.f32 %v389_v33  ;;  %v328_v55 = vsub.f32 0.0, %v2395_v17 }
  0xc7   :  { %v335_v40 = vsub.f32 0.0, %v2398_v31  ;;  %586 = vmatpush.bf16.msra.mxu3 %v543_v63  ;;  %v393_v12 = vmul.f32 1.442695, %v327_v39  ;;  %1537 = vmatmul.msk.bf16.vlgmr.msra.gmra.mxu2 %vm562_vm2, %v2405_v52  ;;  %v2024_v15 = vpop.eup %2023  ;;  %2033 = vpow2.f32 %v391_v35  ;;  %v544_v56 = vpack.c.bf16 %v2379_v32, %v2351_v57 }
  0xc8   :  { %598 = vmatpush.bf16.msrb.mxu2 %v554_v0  ;;  %v555_v11 = vpack.c.bf16 %v534_v3, %v524_v48  ;;  %v336_v16 = vsub.f32 0.0, %v2411_v46  ;;  %v2026_v18 = vpop.eup %2025  ;;  %2035 = vrcp.f32 %v426_v5  ;;  %v395_v42 = vmul.f32 1.442695, %v328_v55 }
  0xc9   :  { %v409_v1 = vmul.f32 1.442695, %v335_v40  ;;  %2037 = vrcp.f32 %v427_v7  ;;  %v2430_v57 = vpop.eup %2027  ;;  %v435_v37 = vadd.f32 1.0, %v2024_v15  ;;  %v436_v44 = vadd.f32 1.0, %v2026_v18 }
  0xca   :  { %v241_v23 = vpop.f32.mrf.mxu2  ;;  %v411_v24 = vmul.f32 1.442695, %v336_v16  ;;  %1538 = vmatmul.msk.bf16.vlgmr.msra.gmra.mxu3 %vm562_vm2, %v2405_v52  ;;  %2039 = vpow2.f32 %v393_v12  ;;  %v2030_v63 = vpop.eup %2029  ;;  %v2446_v0 = vperm.slane %v33_v50, 0  ;;  %v2448_v3 = vperm.slane %v33_v50, 1 }
  0xcb   :  { %611 = vmatpush.bf16.msrb.mxu3 %v555_v11  ;;  %v2424_v28 = vadd.f32 %v241_v23, %v2319_v4  ;;  %v260_v29 = vpop.f32.mrf.mxu3  ;;  %2041 = vpow2.f32 %v409_v1  ;;  %v437_v39 = vadd.f32 1.0, %v2030_v63  ;;  %v428_v23 = vadd.f32 1.0, %v2413_v10 }
  0xcc   :  { %599 = vmatpush.bf16.msrb.mxu2 %v544_v56  ;;  %v2426_v26 = vpop.f32.mrf.mxu0  ;;  %v2433_v32 = vadd.f32 %v260_v29, %v2326_v14  ;;  %v2032_v38 = vpop.eup %2031  ;;  %2043 = vpow2.f32 %v375_v22 }
  0xcd   :  { %v2435_v36 = vpop.f32.mrf.mxu1  ;;  %v337_v4 = vsub.f32 0.0, %v2424_v28  ;;  %v2034_v47 = vpop.eup %2033  ;;  %2045 = vpow2.f32 %v411_v24  ;;  %v445_v14 = vadd.f32 1.0, %v2032_v38  ;;  %v2462_v24 = vadd.f32 %v2426_v26, %v2446_v0 }
  0xce   :  { %v338_v54 = vsub.f32 0.0, %v2433_v32  ;;  %v2439_v25 = vpop.eup %2035  ;;  %2047 = vpow2.f32 %v395_v42  ;;  %v446_v60 = vadd.f32 1.0, %v2034_v47 }
  0xcf   :  { %612 = vmatpush.bf16.msrb.mxu3 %v545_v59  ;;  %v413_v48 = vmul.f32 1.442695, %v337_v4  ;;  %v2441_v53 = vpop.eup %2037  ;;  %2049 = vrcp.f32 %v435_v37  ;;  %v2470_v37 = vadd.f32 %v2435_v36, %v2448_v3 }
  0xd0   :  { %v2040_v61 = vpop.eup %2039  ;;  %2051 = vrcp.f32 %v436_v44  ;;  %v415_v30 = vmul.f32 1.442695, %v338_v54 }
  0xd1   :  { %v2042_v62 = vpop.eup %2041  ;;  %2053 = vpow2.f32 %v413_v48  ;;  %v447_v40 = vadd.f32 1.0, %v2040_v61 }
  0xd2   :  { %v2044_v41 = vpop.eup %2043  ;;  %2055 = vrcp.f32 %v445_v14  ;;  %v455_v49 = vadd.f32 1.0, %v2042_v62 }
  0xd3   :  { %v2046_v35 = vpop.eup %2045  ;;  %2057 = vrcp.f32 %v446_v60  ;;  %v438_v12 = vadd.f32 1.0, %v2044_v41 }
  0xd4   :  { %v274_v33 = vpop.f32.mrf.mxu0  ;;  %v2048_v5 = vpop.eup %2047  ;;  %2059 = vrcp.f32 %v455_v49  ;;  %v456_v6 = vadd.f32 1.0, %v2046_v35 }
  0xd5   :  { %v293_v2 = vpop.f32.mrf.mxu1  ;;  %v2451_v7 = vadd.f32 %v274_v33, %v2446_v0  ;;  %v2050_v11 = vpop.eup %2049  ;;  %2061 = vpow2.f32 %v415_v30  ;;  %v448_v16 = vadd.f32 1.0, %v2048_v5  ;;  %v309_v33 = vsub.f32 0.0, %v2462_v24 }
  0xd6   :  { %v2454_v55 = vadd.f32 %v293_v2, %v2448_v3  ;;  %v2052_v15 = vpop.eup %2051  ;;  %2063 = vrcp.f32 %v456_v6  ;;  %v515_v63 = vmul.f32 %v2050_v11, %v2337_v45 }
  0xd7   :  { %1539 = vmatmul.msk.bf16.vlgmr.msrb.gmra.mxu2 %vm562_vm2, %v2405_v52  ;;  %v2054_v1 = vpop.eup %2053  ;;  %2065 = vrcp.f32 %v437_v39  ;;  %v319_v19 = vsub.f32 0.0, %v2451_v7  ;;  %v516_v49 = vmul.f32 %v2052_v15, %v2348_v51  ;;  %v506_v39 = vmul.f32 %v2439_v25, %v2323_v9 }
  0xd8   :  { %v2056_v56 = vpop.eup %2055  ;;  %2067 = vrcp.f32 %v447_v40  ;;  %v457_v18 = vadd.f32 1.0, %v2054_v1  ;;  %v320_v29 = vsub.f32 0.0, %v2454_v55 }
  0xd9   :  { %v2058_v22 = vpop.eup %2057  ;;  %2069 = vrcp.f32 %v438_v12  ;;  %v525_v38 = vmul.f32 %v2056_v56, %v2368_v8  ;;  %v377_v14 = vmul.f32 1.442695, %v319_v19  ;;  %v357_v12 = vmul.f32 1.442695, %v309_v33  ;;  %v1882_v33 = vld [vmem:[%s2781_s4 + $0x68] sm:$0xff] }
  0xda   :  { %1540 = vmatmul.msk.bf16.vlgmr.msrb.gmra.mxu3 %vm562_vm2, %v2405_v52  ;;  %v2060_v59 = vpop.eup %2059  ;;  %2071 = vrcp.f32 %v457_v18  ;;  %v526_v45 = vmul.f32 %v2058_v22, %v2371_v58  ;;  %v379_v62 = vmul.f32 1.442695, %v320_v29  ;;  %v310_v58 = vsub.f32 0.0, %v2470_v37 }
  0xdb   :  { %v2062_v26 = vpop.eup %2061  ;;  %2073 = vrcp.f32 %v448_v16  ;;  %v535_v44 = vmul.f32 %v2060_v59, %v2398_v31  ;;  %v505_v31 = vmul.f32 %v2430_v57, %v2315_v34  ;;  %v547_v25 = vpack.c.bf16 %v516_v49, %v506_v39  ;;  %v1872_v39 = vld [vmem:[%s2781_s4 + $0x18] sm:$0xff] }
  0xdc   :  { %v277_v42 = vpop.f32.mrf.mxu0  ;;  %v2064_v48 = vpop.eup %2063  ;;  %v458_v54 = vadd.f32 1.0, %v2062_v26  ;;  %v359_v15 = vmul.f32 1.442695, %v310_v58  ;;  %v507_v56 = vmul.f32 %v2441_v53, %v2329_v20  ;;  %v1876_v20 = vld [vmem:[%s2781_s4 + $0x38] sm:$0xff]  ;;  %v1873_v58 = vld [vmem:[%s2781_s4 + $0x20] sm:$0xff] }
  0xdd   :  { %v2473_v10 = vadd.f32 %v277_v42, %v2446_v0  ;;  %v296_v4 = vpop.f32.mrf.mxu1  ;;  %v2066_v60 = vpop.eup %2065  ;;  %v556_v50 = vpack.c.bf16 %v535_v44, %v525_v38  ;;  %v536_v61 = vmul.f32 %v2064_v48, %v2411_v46  ;;  %v546_v5 = vpack.c.bf16 %v515_v63, %v505_v31  ;;  %v1875_v38 = vld [vmem:[%s2781_s4 + $0x30] sm:$0xff] }
  0xde   :  { %v2478_v47 = vadd.f32 %v296_v4, %v2448_v3  ;;  %v2068_v30 = vpop.eup %2067  ;;  %2075 = vrcp.f32 %v458_v54  ;;  %v517_v51 = vmul.f32 %v2066_v60, %v2363_v43  ;;  %v1883_v60 = vld [vmem:[%s2781_s4 + $0x70] sm:$0xff] }
  0xdf   :  { %v329_v36 = vsub.f32 0.0, %v2473_v10  ;;  %v2070_v41 = vpop.eup %2069  ;;  %2077 = vrcp.f32 %v428_v23  ;;  %v557_v2 = vpack.c.bf16 %v536_v61, %v526_v45  ;;  %624 = vmatpush.bf16.msrb.mxu0 %v556_v50  ;;  %v527_v34 = vmul.f32 %v2068_v30, %v2392_v13  ;;  %v1874_v50 = vld [vmem:[%s2781_s4 + $0x28] sm:$0xff] }
  0xe0   :  { %v330_v8 = vsub.f32 0.0, %v2478_v47  ;;  %v2072_v46 = vpop.eup %2071  ;;  %2079 = vpow2.f32 %v377_v14  ;;  %v548_v29 = vpack.c.bf16 %v517_v51, %v507_v56  ;;  %v1879_v56 = vld [vmem:[%s2781_s4 + $0x50] sm:$0xff] }
  0xe1   :  { %v397_v35 = vmul.f32 1.442695, %v329_v36  ;;  %v2074_v40 = vpop.eup %2073  ;;  %v537_v57 = vmul.f32 %v2072_v46, %v2424_v28  ;;  %2081 = vpow2.f32 %v379_v62  ;;  %637 = vmatpush.bf16.msrb.mxu1 %v557_v2  ;;  %v1881_v46 = vld [vmem:[%s2781_s4 + $0x60] sm:$0xff] }
  0xe2   :  { %v399_v6 = vmul.f32 1.442695, %v330_v8  ;;  %v528_v19 = vmul.f32 %v2074_v40, %v2395_v17  ;;  %v518_v17 = vmul.f32 %v2070_v41, %v2386_v21  ;;  %v1884_v21 = vld [vmem:[%s2781_s4 + $0x78] sm:$0xff] }
  0xe3   :  { %v558_v9 = vpack.c.bf16 %v537_v57, %v527_v34  ;;  %2083 = vpow2.f32 %v397_v35  ;;  %625 = vmatpush.bf16.msrb.mxu0 %v546_v5 }
  0xe4   :  { %v279_v11 = vpop.f32.mrf.mxu0  ;;  %v2076_v28 = vpop.eup %2075  ;;  %2085 = vpow2.f32 %v399_v6 }
  0xe5   :  { %v2495_v1 = vadd.f32 %v279_v11, %v2446_v0  ;;  %v298_v16 = vpop.f32.mrf.mxu1  ;;  %v2078_v43 = vpop.eup %2077  ;;  %v538_v0 = vmul.f32 %v2076_v28, %v2433_v32  ;;  %638 = vmatpush.bf16.msrb.mxu1 %v547_v25  ;;  %650 = vmatpush.bf16.msra.mxu2 %v558_v9  ;;  %2087 = vpow2.f32 %v357_v12  ;;  %v1880_v9 = vld [vmem:[%s2781_s4 + $0x58] sm:$0xff] }
  0xe6   :  { %v2498_v13 = vadd.f32 %v298_v16, %v2448_v3  ;;  %v2080_v23 = vpop.eup %2079  ;;  %1541 = vmatmul.msk.bf16.vlgmr.msrb.gmra.mxu0 %vm562_vm2, %v2405_v52  ;;  %2089 = vpow2.f32 %v359_v15  ;;  %v508_v63 = vmul.f32 %v2078_v43, %v2334_v27  ;;  %v1878_v43 = vld [vmem:[%s2781_s4 + $0x48] sm:$0xff] }
  0xe7   :  { %v339_v18 = vsub.f32 0.0, %v2495_v1  ;;  %v2082_v53 = vpop.eup %2081  ;;  %v559_v32 = vpack.c.bf16 %v538_v0, %v528_v19  ;;  %v439_v4 = vadd.f32 1.0, %v2080_v23  ;;  %v1869_v19 = vld [vmem:[%s2781_s4] sm:$0xff]  ;;  %v1908_v0 = vld [vmem:[%s2781_s4 + $0x138] sm:$0xff]  ;;  %v1890_v23 = vld [vmem:[%s2781_s4 + $0xa8] sm:$0xff] }
  0xe8   :  { %v340_v22 = vsub.f32 0.0, %v2498_v13  ;;  %1542 = vmatmul.msk.bf16.vlgmr.msrb.gmra.mxu1 %vm562_vm2, %v2405_v52  ;;  %v440_v26 = vadd.f32 1.0, %v2082_v53  ;;  %v549_v45 = vpack.c.bf16 %v518_v17, %v508_v63  ;;  %v1889_v53 = vld [vmem:[%s2781_s4 + $0xa0] sm:$0xff]  ;;  %v1915_v17 = vld [vmem:[%s2781_s4 + $0x170] sm:$0xff]  ;;  %v1914_v63 = vld [vmem:[%s2781_s4 + $0x168] sm:$0xff] }
  0xe9   :  { %v417_v3 = vmul.f32 1.442695, %v339_v18  ;;  %v2084_v59 = vpop.eup %2083  ;;  %663 = vmatpush.bf16.msra.mxu3 %v559_v32  ;;  %651 = vmatpush.bf16.msra.mxu2 %v548_v29  ;;  %v1891_v18 = vld [vmem:[%s2781_s4 + $0xb0] sm:$0xff]  ;;  %v1916_v29 = vld [vmem:[%s2781_s4 + $0x178] sm:$0xff]  ;;  %v1906_v32 = vld [vmem:[%s2781_s4 + $0x128] sm:$0xff] }
  0xea   :  { %v419_v42 = vmul.f32 1.442695, %v340_v22  ;;  %v2086_v44 = vpop.eup %2085  ;;  %v449_v48 = vadd.f32 1.0, %v2084_v59  ;;  %v1899_v22 = vld [vmem:[%s2781_s4 + $0xf0] sm:$0xff]  ;;  %v1888_v59 = vld [vmem:[%s2781_s4 + $0x98] sm:$0xff] }
  0xeb   :  { %2091 = vpow2.f32 %v417_v3  ;;  %v2088_v54 = vpop.eup %2087  ;;  %v450_v14 = vadd.f32 1.0, %v2086_v44  ;;  %v1877_v3 = vld [vmem:[%s2781_s4 + $0x40] sm:$0xff]  ;;  %v1904_v44 = vld [vmem:[%s2781_s4 + $0x118] sm:$0xff] }
  0xec   :  { %2093 = vpow2.f32 %v419_v42  ;;  %1543 = vmatmul.msk.bf16.vlgmr.msra.gmra.mxu2 %vm562_vm2, %v2405_v52  ;;  %v2090_v27 = vpop.eup %2089  ;;  %v429_v62 = vadd.f32 1.0, %v2088_v54  ;;  %v1897_v42 = vld [vmem:[%s2781_s4 + $0xe0] sm:$0xff]  ;;  %v1912_v54 = vld [vmem:[%s2781_s4 + $0x158] sm:$0xff] }
  0xed   :  { %1350 = vmatpush.bf16.msrb.mxu2 %v1876_v20  ;;  %2095 = vrcp.f32 %v439_v4  ;;  %664 = vmatpush.bf16.msra.mxu3 %v549_v45  ;;  %v430_v30 = vadd.f32 1.0, %v2090_v27  ;;  %v1898_v20 = vld [vmem:[%s2781_s4 + $0xe8] sm:$0xff]  ;;  %v1905_v4 = vld [vmem:[%s2781_s4 + $0x120] sm:$0xff] }
  0xee   :  { %2097 = vrcp.f32 %v440_v26  ;;  %v1896_v26 = vld [vmem:[%s2781_s4 + $0xd8] sm:$0xff]  ;;  %v1886_v45 = vld [vmem:[%s2781_s4 + $0x88] sm:$0xff] }
  0xef   :  { %2099 = vrcp.f32 %v449_v48  ;;  %v1895_v48 = vld [vmem:[%s2781_s4 + $0xd0] sm:$0xff]  ;;  %v1894_v27 = vld [vmem:[%s2781_s4 + $0xc8] sm:$0xff] }
  0xf0   :  { %2101 = vrcp.f32 %v450_v14  ;;  %1544 = vmatmul.msk.bf16.vlgmr.msra.gmra.mxu3 %vm562_vm2, %v2405_v52  ;;  %v1903_v14 = vld [vmem:[%s2781_s4 + $0x110] sm:$0xff] }
  0xf1   :  { %v2092_v36 = vpop.eup %2091  ;;  %1363 = vmatpush.bf16.msrb.mxu3 %v1884_v21  ;;  %1351 = vmatpush.bf16.msrb.mxu2 %v1875_v38  ;;  %v1887_v21 = vld [vmem:[%s2781_s4 + $0x90] sm:$0xff]  ;;  %v1913_v38 = vld [vmem:[%s2781_s4 + $0x160] sm:$0xff] }
  0xf2   :  { %v2094_v61 = vpop.eup %2093  ;;  %v459_v8 = vadd.f32 1.0, %v2092_v36  ;;  %v1911_v36 = vld [vmem:[%s2781_s4 + $0x150] sm:$0xff] }
  0xf3   :  { %v460_v31 = vadd.f32 1.0, %v2094_v61  ;;  %v2096_v41 = vpop.eup %2095  ;;  %v1924_v61 = vld [vmem:[%s2781_s4 + $0x1b8] sm:$0xff] }
  0xf4   :  { %2103 = vrcp.f32 %v459_v8  ;;  %v2098_v49 = vpop.eup %2097  ;;  %v519_v15 = vmul.f32 %v2096_v41, %v2451_v7  ;;  %v1892_v7 = vld [vmem:[%s2781_s4 + $0xb8] sm:$0xff]  ;;  %v1910_v8 = vld [vmem:[%s2781_s4 + $0x148] sm:$0xff]  ;;  %v1931_v41 = vld [vmem:[%s2781_s4 + $0x1f0] sm:$0xff] }
  0xf5   :  { %2105 = vrcp.f32 %v460_v31  ;;  %1364 = vmatpush.bf16.msrb.mxu3 %v1883_v60  ;;  %1352 = vmatpush.bf16.msrb.mxu2 %v1874_v50  ;;  %v2100_v2 = vpop.eup %2099  ;;  %v1885_v60 = vld [vmem:[%s2781_s4 + $0x80] sm:$0xff]  ;;  %v1902_v50 = vld [vmem:[%s2781_s4 + $0x108] sm:$0xff] }
  0xf6   :  { %2107 = vrcp.f32 %v429_v62  ;;  %v2102_v35 = vpop.eup %2101  ;;  %v529_v34 = vmul.f32 %v2100_v2, %v2473_v10  ;;  %v1871_v10 = vld [vmem:[%s2781_s4 + $0x10] sm:$0xff]  ;;  %v1893_v62 = vld [vmem:[%s2781_s4 + $0xc0] sm:$0xff]  ;;  %v1930_v2 = vld [vmem:[%s2781_s4 + $0x1e8] sm:$0xff] }
  0xf7   :  { %2109 = vrcp.f32 %v430_v30  ;;  %v530_v11 = vmul.f32 %v2102_v35, %v2478_v47  ;;  %v1932_v30 = vld [vmem:[%s2781_s4 + $0x1f8] sm:$0xff]  ;;  %v1901_v31 = vld [vmem:[%s2781_s4 + $0x100] sm:$0xff] }
  0xf8   :  { %v1921_v35 = vld [vmem:[%s2781_s4 + $0x1a0] sm:$0xff] }
  0xf9   :  { %1365 = vmatpush.bf16.msrb.mxu3 %v1882_v33  ;;  %1353 = vmatpush.bf16.msrb.mxu2 %v1873_v58  ;;  %v1923_v33 = vld [vmem:[%s2781_s4 + $0x1b0] sm:$0xff]  ;;  %v1909_v58 = vld [vmem:[%s2781_s4 + $0x140] sm:$0xff] }
  0xfa   :  { %v2104_v5 = vpop.eup %2103 }
  0xfb   :  { %v2106_v40 = vpop.eup %2105  ;;  %v539_v57 = vmul.f32 %v2104_v5, %v2495_v1  ;;  %v520_v1 = vmul.f32 %v2098_v49, %v2454_v55  ;;  %v1870_v55 = vld [vmem:[%s2781_s4 + $0x8] sm:$0xff]  ;;  %v1928_v5 = vld [vmem:[%s2781_s4 + $0x1d8] sm:$0xff] }
  0xfc   :  { %v2108_v6 = vpop.eup %2107  ;;  %v540_v51 = vmul.f32 %v2106_v40, %v2498_v13  ;;  %v1922_v49 = vld [vmem:[%s2781_s4 + $0x1a8] sm:$0xff]  ;;  %v1919_v40 = vld [vmem:[%s2781_s4 + $0x190] sm:$0xff] }
  0xfd   :  { %v2110_v12 = vpop.eup %2109  ;;  %v560_v16 = vpack.c.bf16 %v539_v57, %v529_v34  ;;  %1366 = vmatpush.bf16.msrb.mxu3 %v1881_v46  ;;  %1354 = vmatpush.bf16.msrb.mxu2 %v1872_v39  ;;  %v509_v47 = vmul.f32 %v2108_v6, %v2462_v24  ;;  %v1929_v46 = vld [vmem:[%s2781_s4 + $0x1e0] sm:$0xff]  ;;  %v1920_v39 = vld [vmem:[%s2781_s4 + $0x198] sm:$0xff]  ;;  %v1927_v34 = vld [vmem:[%s2781_s4 + $0x1d0] sm:$0xff] }
  0xfe   :  { %v561_v25 = vpack.c.bf16 %v540_v51, %v530_v11  ;;  %v510_v13 = vmul.f32 %v2110_v12, %v2470_v37  ;;  %v1900_v37 = vld [vmem:[%s2781_s4 + $0xf8] sm:$0xff]  ;;  %v1918_v57 = vld [vmem:[%s2781_s4 + $0x188] sm:$0xff] }
  0xff   :  { %676 = vmatpush.bf16.msra.mxu0 %v560_v16  ;;  %v550_v28 = vpack.c.bf16 %v519_v15, %v509_v47  ;;  %v1940_v11 = vld [vmem:[%s2781_s4 + $0x238] sm:$0xff]  ;;  %v1926_v12 = vld [vmem:[%s2781_s4 + $0x1c8] sm:$0xff] }
 0x100   :  { %689 = vmatpush.bf16.msra.mxu1 %v561_v25  ;;  %v551_v24 = vpack.c.bf16 %v520_v1, %v510_v13  ;;  %v1948_v16 = vld [vmem:[%s2781_s4 + $0x278] sm:$0xff]  ;;  %v1947_v1 = vld [vmem:[%s2781_s4 + $0x270] sm:$0xff]  ;;  %v1917_v25 = vld [vmem:[%s2781_s4 + $0x180] sm:$0xff] }
 0x101   :  { %1367 = vmatpush.bf16.msrb.mxu3 %v1880_v9  ;;  %1355 = vmatpush.bf16.msrb.mxu2 %v1871_v10  ;;  %v1939_v10 = vld [vmem:[%s2781_s4 + $0x230] sm:$0xff]  ;;  %v1938_v13 = vld [vmem:[%s2781_s4 + $0x228] sm:$0xff] }
 0x103   :  { %677 = vmatpush.bf16.msra.mxu0 %v550_v28  ;;  %v1946_v28 = vld [vmem:[%s2781_s4 + $0x268] sm:$0xff] }
 0x104   :  { %690 = vmatpush.bf16.msra.mxu1 %v551_v24  ;;  %v1945_v24 = vld [vmem:[%s2781_s4 + $0x260] sm:$0xff] }
 0x105   :  { %1368 = vmatpush.bf16.msrb.mxu3 %v1879_v56  ;;  %1356 = vmatpush.bf16.msrb.mxu2 %v1870_v55  ;;  %v1925_v56 = vld [vmem:[%s2781_s4 + $0x1c0] sm:$0xff] }
 0x106   :  { %1545 = vmatmul.msk.bf16.vlgmr.msra.gmra.mxu0 %vm562_vm2, %v2405_v52  ;;  %v1937_v55 = vld [vmem:[%s2781_s4 + $0x220] sm:$0xff] }
 0x107   :  { %1376 = vmatpush.bf16.msrb.mxu0 %v1892_v7  ;;  %1546 = vmatmul.msk.bf16.vlgmr.msra.gmra.mxu1 %vm562_vm2, %v2405_v52  ;;  %v1907_v52 = vld [vmem:[%s2781_s4 + $0x130] sm:$0xff] }
 0x108   :  { %1389 = vmatpush.bf16.msrb.mxu1 %v1900_v37 }
 0x109   :  { %1369 = vmatpush.bf16.msrb.mxu3 %v1878_v43  ;;  %1357 = vmatpush.bf16.msrb.mxu2 %v1869_v19 }
 0x10b   :  { %1377 = vmatpush.bf16.msrb.mxu0 %v1891_v18  ;;  %v1936_v18 = vld [vmem:[%s2781_s4 + $0x218] sm:$0xff] }
 0x10c   :  { %1390 = vmatpush.bf16.msrb.mxu1 %v1899_v22 }
 0x10d   :  { %1402 = vmatpush.bf16.msra.mxu2 %v1908_v0  ;;  %1370 = vmatpush.bf16.msrb.mxu3 %v1877_v3  ;;  %v1944_v0 = vld [vmem:[%s2781_s4 + $0x258] sm:$0xff]  ;;  %v1943_v3 = vld [vmem:[%s2781_s4 + $0x250] sm:$0xff] }
 0x10f   :  { %1378 = vmatpush.bf16.msrb.mxu0 %v1890_v23  ;;  %v1935_v23 = vld [vmem:[%s2781_s4 + $0x210] sm:$0xff] }
 0x110   :  { %1391 = vmatpush.bf16.msrb.mxu1 %v1898_v20 }
 0x111   :  { %1415 = vmatpush.bf16.msra.mxu3 %v1916_v29  ;;  %1403 = vmatpush.bf16.msra.mxu2 %v1907_v52  ;;  %v1934_v52 = vld [vmem:[%s2781_s4 + $0x208] sm:$0xff] }
 0x113   :  { %1379 = vmatpush.bf16.msrb.mxu0 %v1889_v53 }
 0x114   :  { %1392 = vmatpush.bf16.msrb.mxu1 %v1897_v42  ;;  %v1942_v42 = vld [vmem:[%s2781_s4 + $0x248] sm:$0xff] }
 0x115   :  { %1416 = vmatpush.bf16.msra.mxu3 %v1915_v17  ;;  %1404 = vmatpush.bf16.msra.mxu2 %v1906_v32 }
 0x117   :  { %1380 = vmatpush.bf16.msrb.mxu0 %v1888_v59  ;;  %v1933_v59 = vld [vmem:[%s2781_s4 + $0x200] sm:$0xff] }
 0x118   :  { %1393 = vmatpush.bf16.msrb.mxu1 %v1896_v26 }
 0x119   :  { %1417 = vmatpush.bf16.msra.mxu3 %v1914_v63  ;;  %1405 = vmatpush.bf16.msra.mxu2 %v1905_v4  ;;  %v1941_v4 = vld [vmem:[%s2781_s4 + $0x240] sm:$0xff] }
 0x11b   :  { %1381 = vmatpush.bf16.msrb.mxu0 %v1887_v21 }
 0x11c   :  { %1394 = vmatpush.bf16.msrb.mxu1 %v1895_v48 }
 0x11d   :  { %1418 = vmatpush.bf16.msra.mxu3 %v1913_v38  ;;  %1406 = vmatpush.bf16.msra.mxu2 %v1904_v44 }
 0x11f   :  { %1382 = vmatpush.bf16.msrb.mxu0 %v1886_v45 }
 0x120   :  { %1395 = vmatpush.bf16.msrb.mxu1 %v1894_v27 }
 0x121   :  { %1419 = vmatpush.bf16.msra.mxu3 %v1912_v54  ;;  %1407 = vmatpush.bf16.msra.mxu2 %v1903_v14 }
 0x123   :  { %1383 = vmatpush.bf16.msrb.mxu0 %v1885_v60 }
 0x124   :  { %1396 = vmatpush.bf16.msrb.mxu1 %v1893_v62 }
 0x125   :  { %1420 = vmatpush.bf16.msra.mxu3 %v1911_v36  ;;  %1408 = vmatpush.bf16.msra.mxu2 %v1902_v50 }
 0x127   :  { %1428 = vmatpush.bf16.msra.mxu0 %v1924_v61 }
 0x128   :  { %1441 = vmatpush.bf16.msra.mxu1 %v1932_v30 }
 0x129   :  { %1421 = vmatpush.bf16.msra.mxu3 %v1910_v8  ;;  %1409 = vmatpush.bf16.msra.mxu2 %v1901_v31 }
 0x12b   :  { %1429 = vmatpush.bf16.msra.mxu0 %v1923_v33 }
 0x12c   :  { %1442 = vmatpush.bf16.msra.mxu1 %v1931_v41 }
 0x12d   :  { %1422 = vmatpush.bf16.msra.mxu3 %v1909_v58 }
 0x12f   :  { %1430 = vmatpush.bf16.msra.mxu0 %v1922_v49 }
 0x130   :  { %1443 = vmatpush.bf16.msra.mxu1 %v1930_v2 }
 0x133   :  { %1431 = vmatpush.bf16.msra.mxu0 %v1921_v35  ;;  %v1950_v35 = vld [vmem:[%s2782_s5] ss:$0 sm:$0xff]  ;;  %s2141_s5 = smov [#allocation2]  }
 0x134   :  { %1444 = vmatpush.bf16.msra.mxu1 %v1929_v46  ;;  %s1498_s29 = sshll.u32 %s2141_s5, 4  ;;  %s1499_s29 = int_to_ptr.vmem [resolvable:$true] %s1498_s29 }
 0x137   :  { %1432 = vmatpush.bf16.msra.mxu0 %v1920_v39 }
 0x138   :  { %1445 = vmatpush.bf16.msra.mxu1 %v1928_v5 }
 0x13b   :  { %1433 = vmatpush.bf16.msra.mxu0 %v1919_v40 }
 0x13c   :  { %1446 = vmatpush.bf16.msra.mxu1 %v1927_v34 }
 0x13f   :  { %1434 = vmatpush.bf16.msra.mxu0 %v1918_v57 }
 0x140   :  { %1447 = vmatpush.bf16.msra.mxu1 %v1926_v12 }
 0x143   :  { %1435 = vmatpush.bf16.msra.mxu0 %v1917_v25 }
 0x144   :  { %1448 = vmatpush.bf16.msra.mxu1 %v1925_v56 }
 0x14a   :  { %v575_v6 = vpop.f32.mrf.mxu2 }
 0x14b   :  { %v696_v51 = vpack.c.bf16 %v575_v6, %v575_v6 }
 0x14d   :  { %v588_v15 = vpop.f32.mrf.mxu3  ;;  %1358 = vmatmul.bf16.vlgmr.msrb.gmra.mxu2 %v696_v51 }
 0x14e   :  { %v697_v9 = vpack.c.bf16 %v588_v15, %v588_v15  ;;  %1454 = vmatpush.bf16.msrb.mxu2 %v1940_v11 }
 0x150   :  { %1371 = vmatmul.bf16.vlgmr.msrb.gmra.mxu3 %v697_v9 }
 0x151   :  { %1467 = vmatpush.bf16.msrb.mxu3 %v1948_v16 }
 0x152   :  { %v577_v47 = vpop.f32.mrf.mxu2  ;;  %1455 = vmatpush.bf16.msrb.mxu2 %v1939_v10 }
 0x155   :  { %v590_v7 = vpop.f32.mrf.mxu3  ;;  %1468 = vmatpush.bf16.msrb.mxu3 %v1947_v1 }
 0x156   :  { %1456 = vmatpush.bf16.msrb.mxu2 %v1938_v13 }
 0x159   :  { %1469 = vmatpush.bf16.msrb.mxu3 %v1946_v28 }
 0x15a   :  { %v601_v37 = vpop.f32.mrf.mxu2  ;;  %1457 = vmatpush.bf16.msrb.mxu2 %v1937_v55 }
 0x15b   :  { %v698_v43 = vpack.c.bf16 %v601_v37, %v601_v37 }
 0x15d   :  { %v614_v19 = vpop.f32.mrf.mxu3  ;;  %1384 = vmatmul.bf16.vlgmr.msrb.gmra.mxu0 %v698_v43  ;;  %1470 = vmatpush.bf16.msrb.mxu3 %v1945_v24 }
 0x15e   :  { %v699_v22 = vpack.c.bf16 %v614_v19, %v614_v19  ;;  %1458 = vmatpush.bf16.msrb.mxu2 %v1936_v18 }
 0x160   :  { %1397 = vmatmul.bf16.vlgmr.msrb.gmra.mxu1 %v699_v22 }
 0x161   :  { %1471 = vmatpush.bf16.msrb.mxu3 %v1944_v0 }
 0x162   :  { %v603_v29 = vpop.f32.mrf.mxu2  ;;  %1459 = vmatpush.bf16.msrb.mxu2 %v1935_v23 }
 0x163   :  { %v627_v20 = vpop.f32.mrf.mxu0 }
 0x164   :  { %v700_v53 = vpack.c.bf16 %v627_v20, %v627_v20 }
 0x165   :  { %v616_v17 = vpop.f32.mrf.mxu3  ;;  %1472 = vmatpush.bf16.msrb.mxu3 %v1943_v3  ;;  %v640_v32 = vpop.f32.mrf.mxu1 }
 0x166   :  { %1460 = vmatpush.bf16.msrb.mxu2 %v1934_v52  ;;  %v701_v63 = vpack.c.bf16 %v640_v32, %v640_v32 }
 0x167   :  { %1410 = vmatmul.bf16.vlgmr.msra.gmra.mxu2 %v700_v53 }
 0x168   :  { %1423 = vmatmul.bf16.vlgmr.msra.gmra.mxu3 %v701_v63 }
 0x169   :  { %1473 = vmatpush.bf16.msrb.mxu3 %v1942_v42 }
 0x16a   :  { %1461 = vmatpush.bf16.msrb.mxu2 %v1933_v59 }
 0x16b   :  { %v629_v26 = vpop.f32.mrf.mxu0 }
 0x16d   :  { %v642_v21 = vpop.f32.mrf.mxu1  ;;  %1474 = vmatpush.bf16.msrb.mxu3 %v1941_v4 }
 0x16f   :  { %v653_v38 = vpop.f32.mrf.mxu2 }
 0x170   :  { %v702_v44 = vpack.c.bf16 %v653_v38, %v653_v38 }
 0x172   :  { %1436 = vmatmul.bf16.vlgmr.msra.gmra.mxu0 %v702_v44 }
 0x173   :  { %v666_v48 = vpop.f32.mrf.mxu3 }
 0x174   :  { %v703_v45 = vpack.c.bf16 %v666_v48, %v666_v48 }
 0x176   :  { %1449 = vmatmul.bf16.vlgmr.msra.gmra.mxu1 %v703_v45 }
 0x177   :  { %v655_v54 = vpop.f32.mrf.mxu2 }
 0x17b   :  { %v668_v14 = vpop.f32.mrf.mxu3 }
 0x183   :  { %v679_v27 = vpop.f32.mrf.mxu0 }
 0x184   :  { %v704_v36 = vpack.c.bf16 %v679_v27, %v679_v27  ;;  %v692_v60 = vpop.f32.mrf.mxu1 }
 0x185   :  { %v705_v50 = vpack.c.bf16 %v692_v60, %v692_v60 }
 0x186   :  { %1462 = vmatmul.bf16.vlgmr.msrb.gmra.mxu2 %v704_v36 }
 0x187   :  { %1475 = vmatmul.bf16.vlgmr.msrb.gmra.mxu3 %v705_v50 }
 0x18b   :  { %v681_v61 = vpop.f32.mrf.mxu0 }
 0x18c   :  { %v694_v62 = vpop.f32.mrf.mxu1 }
 0x1d0   :  { %v1359_v8 = vpop.f32.mrf.mxu2 }
 0x1d1   :  { %v1360_v46 = vadd.f32 %v1950_v35, %v1359_v8 }
 0x1d3   :  { %v1372_v30 = vpop.f32.mrf.mxu3 }
 0x1d4   :  { %v1373_v40 = vadd.f32 %v1372_v30, %v1360_v46 }
 0x1d8   :  { %v1361_v31 = vpop.f32.mrf.mxu2 }
 0x1da   :  { %v1385_v33 = vpop.f32.mrf.mxu0 }
 0x1db   :  { %v1374_v58 = vpop.f32.mrf.mxu3  ;;  %v1386_v57 = vadd.f32 %v1385_v33, %v1373_v40 }
 0x1dd   :  { %v1398_v41 = vpop.f32.mrf.mxu1 }
 0x1de   :  { %v1399_v12 = vadd.f32 %v1398_v41, %v1386_v57 }
 0x1e2   :  { %v1387_v49 = vpop.f32.mrf.mxu0 }
 0x1e5   :  { %v1400_v2 = vpop.f32.mrf.mxu1 }
 0x1ea   :  { %v1411_v39 = vpop.f32.mrf.mxu2 }
 0x1eb   :  { %v1424_v5 = vpop.f32.mrf.mxu3  ;;  %v1412_v16 = vadd.f32 %v1411_v39, %v1399_v12 }
 0x1ed   :  { %v1425_v10 = vadd.f32 %v1424_v5, %v1412_v16 }
 0x1ef   :  { %v1437_v34 = vpop.f32.mrf.mxu0 }
 0x1f0   :  { %v1438_v1 = vadd.f32 %v1437_v34, %v1425_v10 }
 0x1f2   :  { %v1413_v6 = vpop.f32.mrf.mxu2 }
 0x1f3   :  { %v1450_v11 = vpop.f32.mrf.mxu1  ;;  %v1426_v51 = vpop.f32.mrf.mxu3 }
 0x1f4   :  { %v1451_v25 = vadd.f32 %v1450_v11, %v1438_v1 }
 0x1f7   :  { %v1439_v15 = vpop.f32.mrf.mxu0 }
 0x1fb   :  { %v1452_v9 = vpop.f32.mrf.mxu1 }
 0x209   :  { %v1463_v47 = vpop.f32.mrf.mxu2 }
 0x20a   :  { %v1464_v13 = vadd.f32 %v1463_v47, %v1451_v25  ;;  %v1476_v7 = vpop.f32.mrf.mxu3 }
 0x20c   :  { %v1477_v28 = vadd.f32 %v1476_v7, %v1464_v13 }
 0x20e   :  { %v1481_v56 = vsel %vm1480_vm3, %v1477_v28, -inf }
 0x20f   :  { %1482 = vmax.xlane.f32.xlu0 %v1481_v56 }
 0x211   :  { %v1465_v55 = vpop.f32.mrf.mxu2 }
 0x212   :  { %v1478_v24 = vpop.f32.mrf.mxu3 }
 0x282   :  { %v1483_v37 = vpop.xlane.xlu0 %1482 }
 0x283   :  { %v1484_v18 = vsub.f32 %v1477_v28, %v1483_v37 }
 0x285   :  { %v1485_v43 = vmul.f32 1.442695, %v1484_v18 }
 0x287   :  { %2111 = vpow2.f32 %v1485_v43 }
 0x28d   :  { %v2112_v19 = vpop.eup %2111 }
 0x28e   :  { %v1487_v0 = vsel %vm1480_vm3, %v2112_v19, 0.0 }
 0x28f   :  { %1488 = vadd.xlane.f32.xlu0 %v1487_v0 }
 0x302   :  { %v1489_v22 = vpop.xlane.xlu0 %1488 }
 0x303   :  { %2113 = vrcp.f32 %v1489_v22 }
 0x309   :  { %v2114_v23 = vpop.eup %2113 }
 0x30a   :  { %v1491_v3 = vmul.f32 %v2114_v23, %v2112_v19 }
 0x30c   :  { %1492 = vst.msk [vmem:[#allocation2] sm:$0x3] %vm1480_vm3, %v1491_v3 }
 0x30d   :  { %1503 = dma.vmem_to_hbm [thread:$0]  %s1499_s29, 32, %s1501_s7, [#allocation3]  }
 0x30e   :  { %2139 = dma.done.wait [#allocation3], 32  }
 0x30f   :  { %2140 = vsyncadd [#allocation3], 4294967264 }
 0x310   :  { %1508 = vsyncpa [#allocation3], 1 }

</bundles_post_ra>
